<compile_context>
chip_gen: v6e
topology: v6e:2x2x1
jax: 0.10.0
libtpu: 0.0.40
codegen_flags: <defaults>
</compile_context>

<pallas_src>
import functools
import math

import jax
import jax.numpy as jnp
from jax.experimental import pallas as pl
from jax.experimental.pallas import tpu as pltpu


# ---------------------------------------------------------------------------
# Pallas kernel: whole ResUp block, one grid point per batch element.
# ---------------------------------------------------------------------------
def _shift_lanes(a, s):
    """out[:, j] = a[:, j + s] (static s), zero-filled outside [0, L-1]."""
    c, l = a.shape
    if s == 0:
        return a
    if abs(s) >= l:
        return jnp.zeros_like(a)
    z = jnp.zeros((c, abs(s)), a.dtype)
    if s > 0:
        return jnp.concatenate([a[:, s:], z], axis=-1)
    return jnp.concatenate([z, a[:, :s]], axis=-1)


def _conv_taps(even, odd, K):
    """im2col taps (k-major rows) of a stride-1 'same' conv over the interleaved
    signal up[2j]=even[j], up[2j+1]=odd[j].  Output columns are in split layout
    [even output positions | odd output positions] -> shape (K*C, 2L)."""
    pad = K // 2
    halves = []
    for r in (0, 1):                       # output-position parity
        rows = []
        for k in range(K):
            d = r + k - pad                # offset in the interleaved signal
            src = even if d % 2 == 0 else odd
            rows.append(_shift_lanes(src, d // 2))
        halves.append(jnp.concatenate(rows, axis=0))      # (K*C, L)
    return jnp.concatenate(halves, axis=-1)               # (K*C, 2L)


def _resup_kernel(x_ref, w13_ref, b13_ref, w2_ref, b2_ref, o_ref, *, K, mid):
    """Fused upsample + (conv1|conv3) + BN1 + SiLU + conv2 + residual + BN2 + SiLU.

    x_ref  : (1, Cin, L)         one batch element
    w13_ref: (mid+Cout, K*Cin)   conv1|conv3 weights, k-major, BN folded
    b13_ref: (mid+Cout, 1)
    w2_ref : (Cout, K*mid)       conv2 weights, k-major, BN2-scale folded
    b2_ref : (Cout, 1)
    o_ref  : (1, Cout, 2L)       split layout [even | odd] along lanes
    """
    x = x_ref[0]                                             # (Cin, L)
    _, L = x.shape

    # 2x linear upsample (align_corners=False) kept in even/odd split form.
    left = jnp.concatenate([x[:, :1], x[:, :-1]], axis=-1)   # x[j-1] (edge-clamped)
    right = jnp.concatenate([x[:, 1:], x[:, -1:]], axis=-1)  # x[j+1] (edge-clamped)
    up_even = 0.25 * left + 0.75 * x                         # up[2j]
    up_odd = 0.75 * x + 0.25 * right                         # up[2j+1]

    # conv1 + conv3 share input taps -> one wide MXU matmul.
    taps_up = _conv_taps(up_even, up_odd, K)                 # (K*Cin, 2L)
    y13 = jnp.dot(w13_ref[...], taps_up,
                  preferred_element_type=jnp.float32) + b13_ref[...]
    h = y13[:mid]                                            # conv1 + BN1 (folded)
    skip = y13[mid:]                                         # conv3 (BN2-scale folded)
    h = h * jax.nn.sigmoid(h)                                # SiLU

    # conv2 + residual add + BN2 (folded) + SiLU.
    taps_h = _conv_taps(h[:, :L], h[:, L:], K)               # (K*mid, 2L)
    y = jnp.dot(w2_ref[...], taps_h,
                preferred_element_type=jnp.float32) + b2_ref[...] + skip
    o_ref[0] = (y * jax.nn.sigmoid(y)).astype(o_ref.dtype)


# ---------------------------------------------------------------------------
# Wrapper: weight layout + BN folding (glue) + pallas_call + NCL de-interleave.
# ---------------------------------------------------------------------------
def _k_major(w):
    """(Cout, Cin, K) conv weight -> (Cout, K*Cin), matching in-kernel tap rows."""
    cout, cin, k = w.shape
    return jnp.transpose(w, (0, 2, 1)).reshape(cout, k * cin)


def _bn_affine(bn, eps):
    scale = bn["gamma"] / jnp.sqrt(bn["var"] + eps)
    shift = bn["beta"] - scale * bn["mean"]
    return scale, shift


def res_up_forward(params, x, *, bn_eps=1e-4):
    """ResUp forward pass (eval-mode BatchNorm folded into the convs)."""
    B, Cin, L = x.shape
    w1, b1 = params["conv1"]
    w2, b2 = params["conv2"]
    w3, b3 = params["conv3"]
    mid, _, K = w1.shape
    Cout = w2.shape[0]
    Lout = 2 * L

    # Fold eval BN: BN1 into conv1; BN2 scale into BOTH conv2 and conv3 since
    # the reference applies BN2 after the residual add (shift added once).
    s1, c1 = _bn_affine(params["bn1"], bn_eps)
    s2, c2 = _bn_affine(params["bn2"], bn_eps)
    w13 = jnp.concatenate([_k_major(w1 * s1[:, None, None]),
                           _k_major(w3 * s2[:, None, None])], axis=0)
    b13 = jnp.concatenate([s1 * b1 + c1, s2 * b3]).reshape(mid + Cout, 1)
    w2k = _k_major(w2 * s2[:, None, None])
    b2k = (s2 * b2 + c2).reshape(Cout, 1)

    out_split = pl.pallas_call(
        functools.partial(_resup_kernel, K=K, mid=mid),
        out_shape=jax.ShapeDtypeStruct((B, Cout, Lout), jnp.float32),
        grid_spec=pltpu.PrefetchScalarGridSpec(
            num_scalar_prefetch=0,
            grid=(B,),
            in_specs=[
                pl.BlockSpec((1, Cin, L), lambda b: (b, 0, 0)),
                pl.BlockSpec((mid + Cout, K * Cin), lambda b: (0, 0)),
                pl.BlockSpec((mid + Cout, 1), lambda b: (0, 0)),
                pl.BlockSpec((Cout, K * mid), lambda b: (0, 0)),
                pl.BlockSpec((Cout, 1), lambda b: (0, 0)),
            ],
            out_specs=pl.BlockSpec((1, Cout, Lout), lambda b: (b, 0, 0)),
        ),
        compiler_params=pltpu.CompilerParams(
            dimension_semantics=("parallel",)),   # batch across v7x's 2 TCs
    )(x, w13, b13, w2k, b2k)

    # De-interleave split [even | odd] lanes back to NCL (layout plumbing only).
    return (out_split.reshape(B, Cout, 2, L)
            .transpose(0, 1, 3, 2).reshape(B, Cout, Lout))


# ---------------------------------------------------------------------------
# Pure-JAX reference (same eval-mode BN semantics) for a correctness check.
# ---------------------------------------------------------------------------
def _res_up_reference(params, x, *, bn_eps=1e-4):
    w1, b1 = params["conv1"]
    w2, b2 = params["conv2"]
    w3, b3 = params["conv3"]

    def upsample2(t):
        left = jnp.concatenate([t[:, :, :1], t[:, :, :-1]], axis=-1)
        right = jnp.concatenate([t[:, :, 1:], t[:, :, -1:]], axis=-1)
        even = 0.25 * left + 0.75 * t
        odd = 0.75 * t + 0.25 * right
        b, c, l = t.shape
        return jnp.stack([even, odd], axis=-1).reshape(b, c, 2 * l)

    def conv(t, w, b):
        pad = w.shape[-1] // 2
        y = jax.lax.conv_general_dilated(
            t, w, (1,), [(pad, pad)],
            dimension_numbers=("NCH", "OIH", "NCH"),
            precision=jax.lax.Precision.HIGHEST)
        return y + b[None, :, None]

    def bn(t, p):
        s = p["gamma"] / jnp.sqrt(p["var"] + bn_eps)
        c = p["beta"] - s * p["mean"]
        return t * s[None, :, None] + c[None, :, None]

    up = upsample2(x)
    skip = conv(up, w3, b3)
    h = jax.nn.silu(bn(conv(up, w1, b1), params["bn1"]))
    y = conv(h, w2, b2) + skip
    return jax.nn.silu(bn(y, params["bn2"]))


# ---------------------------------------------------------------------------
# Deterministic parameter initialization (PyTorch Conv1d default-style bounds).
# ---------------------------------------------------------------------------
def _conv_init(key, cout, cin, k):
    kw, kb = jax.random.split(key)
    bound = 1.0 / math.sqrt(cin * k)
    w = jax.random.uniform(kw, (cout, cin, k), jnp.float32, -bound, bound)
    b = jax.random.uniform(kb, (cout,), jnp.float32, -bound, bound)
    return w, b


def _bn_init(c):
    return dict(gamma=jnp.ones((c,), jnp.float32),
                beta=jnp.zeros((c,), jnp.float32),
                mean=jnp.zeros((c,), jnp.float32),
                var=jnp.ones((c,), jnp.float32))


def init_res_up_params(key, in_channels, out_channels, kernel_size=3):
    k1, k2, k3 = jax.random.split(key, 3)
    mid = in_channels // 2
    return dict(conv1=_conv_init(k1, mid, in_channels, kernel_size),
                conv2=_conv_init(k2, out_channels, mid, kernel_size),
                conv3=_conv_init(k3, out_channels, in_channels, kernel_size),
                bn1=_bn_init(mid),
                bn2=_bn_init(out_channels))


# ---------------------------------------------------------------------------
if __name__ == "__main__":
    in_channels, out_channels, kernel_size = 16, 8, 3
    B, L = 2, 64                                  # output: (2, 8, 128)

    key = jax.random.PRNGKey(0)
    kp, kx = jax.random.split(key)
    params = init_res_up_params(kp, in_channels, out_channels, kernel_size)
    x = jax.random.normal(kx, (B, in_channels, L), jnp.float32)

    out = jax.jit(res_up_forward)(params, x)
    jax.block_until_ready(out)
    assert out.shape == (B, out_channels, 2 * L), out.shape

    ref = _res_up_reference(params, x)
    err = float(jnp.max(jnp.abs(out - ref)))
    assert err < 1e-2, f"max abs error vs reference: {err}"
    print("KERNEL_OK")
</pallas_src>

<mosaic_0001>
module attributes {stable_mosaic.version = 11 : i64} {
  func.func @_resup_kernel(%arg0: i32, %arg1: memref<1x16x64xf32, #tpu.memory_space<vmem>>, %arg2: memref<16x48xf32, #tpu.memory_space<vmem>>, %arg3: memref<16x1xf32, #tpu.memory_space<vmem>>, %arg4: memref<8x24xf32, #tpu.memory_space<vmem>>, %arg5: memref<8x1xf32, #tpu.memory_space<vmem>>, %arg6: memref<1x8x128xf32, #tpu.memory_space<vmem>>) attributes {dimension_semantics = [#tpu.dimension_semantics<parallel>], iteration_bounds = array<i64: 2>, scalar_prefetch = 0 : i64, scratch_operands = 0 : i64, tpu.core_type = #tpu.core_type<tc>, window_params = [{transform_indices = @transform_0, window_bounds = array<i64: 1, 16, 64>}, {pipeline_mode = #tpu.pipeline_mode<synchronous>, transform_indices = @transform_1, window_bounds = array<i64: 16, 48>}, {pipeline_mode = #tpu.pipeline_mode<synchronous>, transform_indices = @transform_2, window_bounds = array<i64: 16, 1>}, {pipeline_mode = #tpu.pipeline_mode<synchronous>, transform_indices = @transform_3, window_bounds = array<i64: 8, 24>}, {pipeline_mode = #tpu.pipeline_mode<synchronous>, transform_indices = @transform_4, window_bounds = array<i64: 8, 1>}, {transform_indices = @transform_5, window_bounds = array<i64: 1, 8, 128>}]} {
    %c0 = arith.constant 0 : index
    %c0_0 = arith.constant 0 : index
    %c0_1 = arith.constant 0 : index
    %0 = vector.load %arg1[%c0, %c0_0, %c0_1] : memref<1x16x64xf32, #tpu.memory_space<vmem>>, vector<1x16x64xf32>
    %1 = vector.shape_cast %0 : vector<1x16x64xf32> to vector<16x64xf32>
    %2 = vector.extract_strided_slice %1 {offsets = [0, 0], sizes = [16, 1], strides = [1, 1]} : vector<16x64xf32> to vector<16x1xf32>
    %3 = vector.extract_strided_slice %1 {offsets = [0, 0], sizes = [16, 63], strides = [1, 1]} : vector<16x64xf32> to vector<16x63xf32>
    %4 = tpu.concatenate %2, %3 in 1 : vector<16x1xf32>, vector<16x63xf32> -> vector<16x64xf32>
    %5 = vector.extract_strided_slice %1 {offsets = [0, 1], sizes = [16, 63], strides = [1, 1]} : vector<16x64xf32> to vector<16x63xf32>
    %6 = vector.extract_strided_slice %1 {offsets = [0, 63], sizes = [16, 1], strides = [1, 1]} : vector<16x64xf32> to vector<16x1xf32>
    %7 = tpu.concatenate %5, %6 in 1 : vector<16x63xf32>, vector<16x1xf32> -> vector<16x64xf32>
    %cst = arith.constant 2.500000e-01 : f32
    %8 = vector.broadcast %cst : f32 to vector<16x64xf32>
    %9 = arith.mulf %8, %4 : vector<16x64xf32>
    %cst_2 = arith.constant 7.500000e-01 : f32
    %10 = vector.broadcast %cst_2 : f32 to vector<16x64xf32>
    %11 = arith.mulf %10, %1 : vector<16x64xf32>
    %12 = arith.addf %9, %11 : vector<16x64xf32>
    %cst_3 = arith.constant 7.500000e-01 : f32
    %13 = vector.broadcast %cst_3 : f32 to vector<16x64xf32>
    %14 = arith.mulf %13, %1 : vector<16x64xf32>
    %cst_4 = arith.constant 2.500000e-01 : f32
    %15 = vector.broadcast %cst_4 : f32 to vector<16x64xf32>
    %16 = arith.mulf %15, %7 : vector<16x64xf32>
    %17 = arith.addf %14, %16 : vector<16x64xf32>
    %cst_5 = arith.constant 0.000000e+00 : f32
    %18 = vector.broadcast %cst_5 : f32 to vector<16x1xf32>
    %19 = vector.extract_strided_slice %17 {offsets = [0, 0], sizes = [16, 63], strides = [1, 1]} : vector<16x64xf32> to vector<16x63xf32>
    %20 = tpu.concatenate %18, %19 in 1 : vector<16x1xf32>, vector<16x63xf32> -> vector<16x64xf32>
    %21 = tpu.concatenate %20, %12, %17 in 0 : vector<16x64xf32>, vector<16x64xf32>, vector<16x64xf32> -> vector<48x64xf32>
    %cst_6 = arith.constant 0.000000e+00 : f32
    %22 = vector.broadcast %cst_6 : f32 to vector<16x1xf32>
    %23 = vector.extract_strided_slice %12 {offsets = [0, 1], sizes = [16, 63], strides = [1, 1]} : vector<16x64xf32> to vector<16x63xf32>
    %24 = tpu.concatenate %23, %22 in 1 : vector<16x63xf32>, vector<16x1xf32> -> vector<16x64xf32>
    %25 = tpu.concatenate %12, %17, %24 in 0 : vector<16x64xf32>, vector<16x64xf32>, vector<16x64xf32> -> vector<48x64xf32>
    %26 = tpu.concatenate %21, %25 in 1 : vector<48x64xf32>, vector<48x64xf32> -> vector<48x128xf32>
    %c0_7 = arith.constant 0 : index
    %c0_8 = arith.constant 0 : index
    %27 = vector.load %arg2[%c0_7, %c0_8] : memref<16x48xf32, #tpu.memory_space<vmem>>, vector<16x48xf32>
    %cst_9 = arith.constant dense<0.000000e+00> : vector<16x128xf32>
    %28 = tpu.matmul %27, %26, %cst_9 {dimension_numbers = #tpu.dot_dimension_numbers<[1], [0], [0], [1], [0, 0, 1, 1], [], []>} : vector<16x48xf32>, vector<48x128xf32>, vector<16x128xf32> -> vector<16x128xf32>
    %c0_10 = arith.constant 0 : index
    %c0_11 = arith.constant 0 : index
    %29 = vector.load %arg3[%c0_10, %c0_11] : memref<16x1xf32, #tpu.memory_space<vmem>>, vector<16x1xf32>
    %30 = vector.broadcast %29 : vector<16x1xf32> to vector<16x128xf32>
    %31 = arith.addf %28, %30 : vector<16x128xf32>
    %32 = vector.extract_strided_slice %31 {offsets = [0, 0], sizes = [8, 128], strides = [1, 1]} : vector<16x128xf32> to vector<8x128xf32>
    %33 = vector.extract_strided_slice %31 {offsets = [8, 0], sizes = [8, 128], strides = [1, 1]} : vector<16x128xf32> to vector<8x128xf32>
    %34 = arith.negf %32 : vector<8x128xf32>
    %35 = math.exp %34 : vector<8x128xf32>
    %cst_12 = arith.constant 1.000000e+00 : f32
    %36 = vector.broadcast %cst_12 : f32 to vector<8x128xf32>
    %37 = arith.addf %36, %35 : vector<8x128xf32>
    %38 = arith.divf %36, %37 : vector<8x128xf32>
    %39 = arith.mulf %32, %38 : vector<8x128xf32>
    %40 = vector.extract_strided_slice %39 {offsets = [0, 0], sizes = [8, 64], strides = [1, 1]} : vector<8x128xf32> to vector<8x64xf32>
    %41 = vector.extract_strided_slice %39 {offsets = [0, 64], sizes = [8, 64], strides = [1, 1]} : vector<8x128xf32> to vector<8x64xf32>
    %cst_13 = arith.constant 0.000000e+00 : f32
    %42 = vector.broadcast %cst_13 : f32 to vector<8x1xf32>
    %43 = vector.extract_strided_slice %41 {offsets = [0, 0], sizes = [8, 63], strides = [1, 1]} : vector<8x64xf32> to vector<8x63xf32>
    %44 = tpu.concatenate %42, %43 in 1 : vector<8x1xf32>, vector<8x63xf32> -> vector<8x64xf32>
    %45 = tpu.concatenate %44, %40, %41 in 0 : vector<8x64xf32>, vector<8x64xf32>, vector<8x64xf32> -> vector<24x64xf32>
    %cst_14 = arith.constant 0.000000e+00 : f32
    %46 = vector.broadcast %cst_14 : f32 to vector<8x1xf32>
    %47 = vector.extract_strided_slice %40 {offsets = [0, 1], sizes = [8, 63], strides = [1, 1]} : vector<8x64xf32> to vector<8x63xf32>
    %48 = tpu.concatenate %47, %46 in 1 : vector<8x63xf32>, vector<8x1xf32> -> vector<8x64xf32>
    %49 = tpu.concatenate %40, %41, %48 in 0 : vector<8x64xf32>, vector<8x64xf32>, vector<8x64xf32> -> vector<24x64xf32>
    %50 = tpu.concatenate %45, %49 in 1 : vector<24x64xf32>, vector<24x64xf32> -> vector<24x128xf32>
    %c0_15 = arith.constant 0 : index
    %c0_16 = arith.constant 0 : index
    %51 = vector.load %arg4[%c0_15, %c0_16] : memref<8x24xf32, #tpu.memory_space<vmem>>, vector<8x24xf32>
    %cst_17 = arith.constant dense<0.000000e+00> : vector<8x128xf32>
    %52 = tpu.matmul %51, %50, %cst_17 {dimension_numbers = #tpu.dot_dimension_numbers<[1], [0], [0], [1], [0, 0, 1, 1], [], []>} : vector<8x24xf32>, vector<24x128xf32>, vector<8x128xf32> -> vector<8x128xf32>
    %c0_18 = arith.constant 0 : index
    %c0_19 = arith.constant 0 : index
    %53 = vector.load %arg5[%c0_18, %c0_19] : memref<8x1xf32, #tpu.memory_space<vmem>>, vector<8x1xf32>
    %54 = vector.broadcast %53 : vector<8x1xf32> to vector<8x128xf32>
    %55 = arith.addf %52, %54 : vector<8x128xf32>
    %56 = arith.addf %55, %33 : vector<8x128xf32>
    %57 = arith.negf %56 : vector<8x128xf32>
    %58 = math.exp %57 : vector<8x128xf32>
    %cst_20 = arith.constant 1.000000e+00 : f32
    %59 = vector.broadcast %cst_20 : f32 to vector<8x128xf32>
    %60 = arith.addf %59, %58 : vector<8x128xf32>
    %61 = arith.divf %59, %60 : vector<8x128xf32>
    %62 = arith.mulf %56, %61 : vector<8x128xf32>
    %c0_21 = arith.constant 0 : index
    %c0_22 = arith.constant 0 : index
    %c0_23 = arith.constant 0 : index
    %63 = vector.load %arg6[%c0_21, %c0_22, %c0_23] : memref<1x8x128xf32, #tpu.memory_space<vmem>>, vector<1x8x128xf32>
    %64 = vector.shape_cast %63 : vector<1x8x128xf32> to vector<8x128xf32>
    %65 = vector.shape_cast %62 : vector<8x128xf32> to vector<1x8x128xf32>
    tpu.vector_store %arg6[%c0_21, %c0_22, %c0_23], %65 {strides = array<i32>} : memref<1x8x128xf32, #tpu.memory_space<vmem>>, vector<1x8x128xf32>,
    return
  }
  func.func @transform_0(%arg0: i32) -> (i32, i32, i32) {
    %c0_i32 = arith.constant 0 : i32
    %c0_i32_0 = arith.constant 0 : i32
    %c0_i32_1 = arith.constant 0 : i32
    return %arg0, %c0_i32, %c0_i32_0 : i32, i32, i32
  }
  func.func @transform_1(%arg0: i32) -> (i32, i32) {
    %c0_i32 = arith.constant 0 : i32
    %c0_i32_0 = arith.constant 0 : i32
    %c0_i32_1 = arith.constant 0 : i32
    return %c0_i32, %c0_i32_0 : i32, i32
  }
  func.func @transform_2(%arg0: i32) -> (i32, i32) {
    %c0_i32 = arith.constant 0 : i32
    %c0_i32_0 = arith.constant 0 : i32
    %c0_i32_1 = arith.constant 0 : i32
    return %c0_i32, %c0_i32_0 : i32, i32
  }
  func.func @transform_3(%arg0: i32) -> (i32, i32) {
    %c0_i32 = arith.constant 0 : i32
    %c0_i32_0 = arith.constant 0 : i32
    %c0_i32_1 = arith.constant 0 : i32
    return %c0_i32, %c0_i32_0 : i32, i32
  }
  func.func @transform_4(%arg0: i32) -> (i32, i32) {
    %c0_i32 = arith.constant 0 : i32
    %c0_i32_0 = arith.constant 0 : i32
    %c0_i32_1 = arith.constant 0 : i32
    return %c0_i32, %c0_i32_0 : i32, i32
  }
  func.func @transform_5(%arg0: i32) -> (i32, i32, i32) {
    %c0_i32 = arith.constant 0 : i32
    %c0_i32_0 = arith.constant 0 : i32
    %c0_i32_1 = arith.constant 0 : i32
    return %arg0, %c0_i32, %c0_i32_0 : i32, i32, i32
  }
}

</mosaic_0001>

<bundles_post_ra>
// kernel: mul.28
= control target key start
LH: loop header
LB: loop body
LE: loop exit
PB: predicated region body
PF: predicated region fallthrough
CT: control target
= control target key end

     0   :  { %s34_s0 = inlined_call_operand.vmem [shape: f32[8], index: 0, kind: input, shape index: {}]   ;;  %s35_s1 = inlined_call_operand.vmem [shape: f32[8], index: 1, kind: input, shape index: {}]   ;;  %s36_s2 = inlined_call_operand.vmem [shape: f32[8], index: 2, kind: output, shape index: {}]  }
   0x1   :  { %v3_v0 = vld [vmem:[%s34_s0] sm:$0x1] }
   0x2   :  { %v4_v1 = vld [vmem:[%s35_s1] sm:$0x1] }
   0x3   :  { %v7_v2 = vmul.f32 %v4_v1, %v3_v0 }
   0x5   :  { %9 = vst [vmem:[%s36_s2] sm:$0x1] %v7_v2 }

// kernel: res_up_forward.1
= control target key start
LH: loop header
LB: loop body
LE: loop exit
PB: predicated region body
PF: predicated region fallthrough
CT: control target
= control target key end

     0   :  { %s692_s18 = smov 0   ;;  %s770_s0 = inlined_call_operand.vmem [shape: f32[2,16,64], index: 0, kind: input, shape index: {}]   ;;  %s771_s1 = inlined_call_operand.vmem [shape: f32[16,48], index: 1, kind: input, shape index: {}]   ;;  %s772_s2 = inlined_call_operand.vmem [shape: f32[16,1], index: 2, kind: input, shape index: {}]   ;;  %s773_s3 = inlined_call_operand.vmem [shape: f32[8,24], index: 3, kind: input, shape index: {}]   ;;  %s774_s4 = inlined_call_operand.vmem [shape: f32[8,1], index: 4, kind: input, shape index: {}]   ;;  %s775_s5 = inlined_call_operand.vmem [shape: f32[2,8,128], index: 5, kind: output, shape index: {}]  }
   0x1 LB: > { %s570_s19 = sadd.s32 4294967295, %s653_s18   ;;  %p574_p0 = scmp.ge.s32.totalorder %s653_s18, 1  ;;  %s653_s18 = sphi %s692_s18, %s15_s18  }
   0x2   : > { %p187_p1 = scmp.lt.s32.totalorder %s653_s18, 3 }
   0x4   : > { %p188_p2 = pnand %p574_p0, %p187_p1 }
   0x5   : > { %p214_p3 = scmp.lt.s32.totalorder (!%p188_p2), %s570_s19, 1  ;;  %s655_s24 = smov (!%p188_p2), 1  }
   0x6   : > { %191 = sbr.rel (%p188_p2) target bundleno = 1083 (0x43b), region = 40  ;;  %s656_s25 = smov (!%p188_p2), 127  }
   0x7   : > { %s657_s26 = smov (!%p188_p2), 64   ;;  %s661_s8 = smov (!%p188_p2), 65  }
   0xb   : > { %s777_s19 = smov (!%p214_p3, %s570_s19), 1  ;;  %vm233_vm0 = vcmask 7168   ;;  %vm242_vm1 = vcmask 515072   ;;  %v302_v21 = vld [vmem:[%s771_s1] sm:$0xff]  ;;  %vm316_vm2 = vcmask 392192   ;;  %v658_v25 = vmov 0  }
   0xc   : > { %s585_s20 = sshll.u32 %s777_s19, 4  ;;  %610 = vmatprep.mubr.msk.f32.mxu0 %vm316_vm2, %v302_v21  ;;  %637 = vset.pattern.permute.xlu0 %v658_v25  ;;  %v304_v26 = vld [vmem:[%s772_s2] sm:$0xff]  ;;  %vm295_vm3 = vcmask 523264   ;;  %v303_v43 = vld [vmem:[%s771_s1 + $0x8] sm:$0xff]  ;;  %v659_v53 = vmov 0.0   ;;  %vm660_vm4 = vmmov 0  }
   0xd   : > { %s218_s23 = scalar_lea.vmem %s770_s0, %s585_s20  ;;  %638 = vset.pattern.permute.xlu1 %v658_v25  ;;  %613 = vmatprep.subr.mxu1 %v659_v53  ;;  %v305_v57 = vld [vmem:[%s772_s2 + $0x8] sm:$0xff]  ;;  %v428_v58 = vld [vmem:[%s774_s4] sm:$0xff]  ;;  %vm434_vm5 = vcmask 195584   ;;  %s577_s15 = sshll.u32 %s777_s19, 3 }
   0xe   : > { %v224_v0 = vld [vmem:[%s218_s23 + $0x8] sm:$0xff]  ;;  %v223_v1 = vld [vmem:[%s218_s23] sm:$0xff]  ;;  %619 = vmatprep.mubr.msk.f32.mxu1 %vm660_vm4, %v659_v53  ;;  %s222_s20 = scalar_lea.vmem %s775_s5, %s577_s15 }
   0xf   : > { %229 = vrot.lane.b32.xlu0 %v224_v0, %s655_s24  ;;  %238 = vrot.lane.b32.xlu1 %v224_v0, %s656_s25  ;;  %v248_v3 = vmul.f32 0.75, %v224_v0  ;;  %v247_v8 = vmul.f32 0.75, %v223_v1 }
  0x13   : > { %227 = vrot.lane.b32.xlu0 %v223_v1, %s655_s24 }
  0x17   : > { %236 = vrot.lane.b32.xlu0 %v223_v1, %s656_s25 }
  0x81   : > { %v230_v2 = vpop.permute.xlu0 %229  ;;  %v239_v16 = vpop.permute.xlu1 %238 }
  0x82   : > { %v235_v4 = vsel %vm233_vm0, %v224_v0, %v230_v2  ;;  %v244_v17 = vsel %vm242_vm1, %v239_v16, %v224_v0 }
  0x83   : > { %v246_v5 = vmul.f32 0.25, %v235_v4  ;;  %v252_v18 = vmul.f32 0.25, %v244_v17 }
  0x85   : > { %v228_v6 = vpop.permute.xlu0 %227  ;;  %v250_v7 = vadd.f32 %v248_v3, %v246_v5  ;;  %v254_v23 = vadd.f32 %v252_v18, %v248_v3 }
  0x86   : > { %v234_v9 = vsel %vm233_vm0, %v223_v1, %v228_v6 }
  0x87   : > { %v245_v10 = vmul.f32 0.25, %v234_v9  ;;  %269 = vrot.lane.b32.xlu1 %v250_v7, %s656_s25 }
  0x89   : > { %v237_v11 = vpop.permute.xlu0 %236  ;;  %v249_v12 = vadd.f32 %v247_v8, %v245_v10 }
  0x8a   : > { %v243_v13 = vsel %vm242_vm1, %v237_v11, %v223_v1  ;;  %v427_v1 = vld [vmem:[%s773_s3] sm:$0xff] }
  0x8b   : > { %v251_v14 = vmul.f32 0.25, %v243_v13  ;;  %267 = vrot.lane.b32.xlu1 %v249_v12, %s656_s25 }
  0x8d   : > { %v253_v15 = vadd.f32 %v251_v14, %v247_v8 }
  0x8f   : > { %281 = vrot.lane.b32.xlu1 %v253_v15, %s657_s26 }
  0xf9   : > { %v270_v19 = vpop.permute.xlu1 %269 }
  0xfa   : > { %v274_v20 = vsel %vm242_vm1, %v270_v19, 0.0 }
  0xfb   : > { %287 = vrot.lane.b32.xlu0 %v274_v20, %s657_s26 }
  0xfd   : > { %v268_v22 = vpop.permute.xlu1 %267 }
  0xfe   : > { %v273_v24 = vsel %vm242_vm1, %v268_v22, 0.0 }
  0xff   : > { %283 = vrot.lane.b32.xlu0 %v254_v23, %s657_s26  ;;  %285 = vrot.lane.b32.xlu1 %v273_v24, %s657_s26 }
 0x101   : > { %v282_v27 = vpop.permute.xlu1 %281 }
 0x102   : > { %v298_v37 = vsel %vm295_vm3, %v249_v12, %v282_v27 }
 0x103   : > { %259 = vrot.lane.b32.xlu0 %v254_v23, %s655_s24  ;;  %279 = vrot.lane.b32.xlu1 %v250_v7, %s657_s26 }
 0x107   : > { %257 = vrot.lane.b32.xlu0 %v253_v15, %s655_s24  ;;  %277 = vrot.lane.b32.xlu1 %v249_v12, %s657_s26 }
 0x10b   : > { %308 = vperm.xlu0 %637, %v304_v26  }
 0x16d   : > { %v288_v28 = vpop.permute.xlu0 %287 }
 0x16e   : > { %v301_v29 = vsel %vm295_vm3, %v254_v23, %v288_v28 }
 0x16f   : > { %598 = vmatprep.subr.mxu0 %v301_v29 }
 0x170   : > { %599 = vmatpush3.msra.mxu0 %v301_v29 }
 0x171   : > { %v284_v30 = vpop.permute.xlu0 %283  ;;  %v286_v31 = vpop.permute.xlu1 %285 }
 0x172   : > { %v300_v32 = vsel %vm295_vm3, %v253_v15, %v286_v31  ;;  %v299_v33 = vsel %vm295_vm3, %v250_v7, %v284_v30 }
 0x173   : > { %600 = vmatprep.subr.mxu0 %v300_v32 }
 0x174   : > { %601 = vmatpush3.msra.mxu0 %v300_v32 }
 0x175   : > { %v260_v34 = vpop.permute.xlu0 %259  ;;  %602 = vmatprep.subr.mxu0 %v299_v33  ;;  %v280_v35 = vpop.permute.xlu1 %279 }
 0x176   : > { %v264_v36 = vsel %vm233_vm0, 0.0, %v260_v34  ;;  %603 = vmatpush3.msra.mxu0 %v299_v33 }
 0x177   : > { %604 = vmatprep.subr.mxu0 %v298_v37  ;;  %v297_v38 = vsel %vm295_vm3, %v264_v36, %v280_v35 }
 0x178   : > { %605 = vmatpush3.msra.mxu0 %v298_v37 }
 0x179   : > { %v258_v39 = vpop.permute.xlu0 %257  ;;  %606 = vmatprep.subr.mxu0 %v297_v38  ;;  %v278_v40 = vpop.permute.xlu1 %277 }
 0x17a   : > { %v263_v41 = vsel %vm233_vm0, 0.0, %v258_v39  ;;  %607 = vmatpush3.msra.mxu0 %v297_v38 }
 0x17b   : > { %v296_v42 = vsel %vm295_vm3, %v263_v41, %v278_v40 }
 0x17c   : > { %608 = vmatprep.subr.mxu0 %v296_v42 }
 0x17d   : > { %609 = vmatpush3.msra.mxu0 %v296_v42 }
 0x17e   : > { %611 = vmatmul.mubr.msk.f32.vlgmr.msra.gmra.mxu0 %vm316_vm2, %v303_v43 }
 0x186   : > { %v309_v45 = vpop.permute.xlu0 %308 }
 0x23e   : > { %v612_v44 = vpop.f32.mrf.mxu0 }
 0x240   : > { %v389_v46 = vpop.f32.mrf.mxu0 }
 0x241   : > { %v390_v47 = vadd.f32 %v389_v46, %v309_v45 }
 0x243   : > { %v580_v48 = vmul.f32 -1.442695, %v390_v47 }
 0x245   : > { %639 = vpow2.f32 %v580_v48 }
 0x252   : > { %v640_v49 = vpop.eup %639 }
 0x253   : > { %v401_v50 = vadd.f32 1.0, %v640_v49 }
 0x255   : > { %641 = vrcp.f32 %v401_v50 }
 0x262   : > { %v642_v51 = vpop.eup %641 }
 0x263   : > { %v404_v52 = vmul.f32 %v642_v51, %v390_v47 }
 0x265   : > { %413 = vrot.lane.b32.xlu1 %v404_v52, %s656_s25 }
 0x269   : > { %410 = vrot.lane.b32.xlu1 %v404_v52, %s657_s26 }
 0x2d7   : > { %v414_v54 = vpop.permute.xlu1 %413 }
 0x2d8   : > { %v416_v55 = vsel %vm242_vm1, %v414_v54, 0.0 }
 0x2d9   : > { %420 = vrot.lane.b32.xlu0 %v416_v55, %s657_s26 }
 0x2db   : > { %v411_v56 = vpop.permute.xlu1 %410 }
 0x2dc   : > { %418 = vrot.lane.b32.xlu1 %v411_v56, %s657_s26 }
 0x2dd   : > { %406 = vrot.lane.b32.xlu0 %v404_v52, %s661_s8 }
 0x2e0   : > { %313 = vperm.xlu1 %638, %v305_v57  }
 0x2e1   : > { %431 = vperm.xlu0 %637, %v428_v58  }
 0x34b   : > { %v421_v59 = vpop.permute.xlu0 %420 }
 0x34c   : > { %v426_v60 = vsel %vm295_vm3, %v411_v56, %v421_v59 }
 0x34d   : > { %614 = vmatpush3.msra.mxu1 %v426_v60 }
 0x34e   : > { %v419_v61 = vpop.permute.xlu1 %418  ;;  %615 = vmatprep.subr.mxu1 %v659_v53 }
 0x34f   : > { %v407_v62 = vpop.permute.xlu0 %406  ;;  %v425_v63 = vsel %vm295_vm3, %v404_v52, %v419_v61 }
 0x350   : > { %v409_v0 = vsel %vm233_vm0, 0.0, %v407_v62  ;;  %616 = vmatpush3.msra.mxu1 %v425_v63 }
 0x351   : > { %617 = vmatprep.subr.mxu1 %v659_v53  ;;  %v424_v2 = vsel %vm295_vm3, %v409_v0, %v411_v56 }
 0x352   : > { %618 = vmatpush3.msra.mxu1 %v424_v2 }
 0x353   : > { %620 = vmatmul.mubr.msk.f32.vlgmr.msra.gmra.mxu1 %vm434_vm5, %v427_v1 }
 0x35b   : > { %v314_v3 = vpop.permute.xlu1 %313 }
 0x35c   : > { %v432_v4 = vpop.permute.xlu0 %431  ;;  %v395_v6 = vadd.f32 %v612_v44, %v314_v3 }
 0x413   : > { %v504_v5 = vpop.f32.mrf.mxu1 }
 0x414   : > { %v505_v7 = vadd.f32 %v504_v5, %v432_v4 }
 0x415   : > { %v621_v8 = vpop.f32.mrf.mxu1 }
 0x416   : > { %v508_v9 = vadd.f32 %v505_v7, %v395_v6 }
 0x418   : > { %v582_v10 = vmul.f32 -1.442695, %v508_v9 }
 0x41a   : > { %643 = vpow2.f32 %v582_v10 }
 0x427   : > { %v644_v11 = vpop.eup %643 }
 0x428   : > { %v512_v12 = vadd.f32 1.0, %v644_v11 }
 0x42a   : > { %645 = vrcp.f32 %v512_v12 }
 0x437   : > { %v646_v13 = vpop.eup %645 }
 0x438   : > { %v515_v14 = vmul.f32 %v646_v13, %v508_v9 }
 0x43a   : > { %516 = vst [vmem:[%s222_s20] sm:$0xff] %v515_v14 }
 0x43b PF: > { %s15_s18 = sadd.s32 1, %s653_s18  }
 0x43c   : > { %p12_p4 = scmp.ge.s32.totalorder %s15_s18, 4  }
 0x43e   :  { %14 = sbr.rel (!%p12_p4) target bundleno = 1 (0x1), region = 70 }

</bundles_post_ra>
